<compile_context>
chip_gen: v7x
topology: tpu7x:2x2x1
jax: 0.10.0
libtpu: 0.0.40
codegen_flags: <defaults>
</compile_context>

<pallas_src>
import jax
import jax.numpy as jnp
from jax.experimental import pallas as pl
from jax.experimental.pallas import tpu as pltpu

_LANES = 128
_BLOCK_ROWS = 2048          # (2048, 128) f32 = 1 MiB per buffer
_SMALL_N_MAX = 1 << 15      # below this, a single un-tiled dispatch wins


def _affine_kernel(p_ref, x_ref, o_ref):
    # p_ref: f32[2] in SMEM -> p_ref[0] = W[0,0], p_ref[1] = b[0,0]
    # x_ref / o_ref: f32 VMEM blocks (either (N, 1) or (block_rows, 128)).
    # One broadcast VPU FMA; no MXU involvement.
    o_ref[...] = x_ref[...] * p_ref[0] + p_ref[1]


def _forward_single_block(params, x32):
    """One dispatch on the natural (N, 1) array (small N)."""
    n = x32.shape[0]
    return pl.pallas_call(
        _affine_kernel,
        out_shape=jax.ShapeDtypeStruct((n, 1), jnp.float32),
        in_specs=[
            pl.BlockSpec(memory_space=pltpu.MemorySpace.SMEM),   # [w, b]
            pl.BlockSpec(memory_space=pltpu.MemorySpace.VMEM),   # x, full array
        ],
        out_specs=pl.BlockSpec(memory_space=pltpu.MemorySpace.VMEM),
    )(params, x32)


def _forward_tiled(params, x_flat):
    """Lane-dense, row-gridded path for large N."""
    n = x_flat.shape[0]
    block_elems = _BLOCK_ROWS * _LANES
    n_blocks = pl.cdiv(n, block_elems)
    rows = n_blocks * _BLOCK_ROWS
    padded = rows * _LANES
    # Pad to a whole number of (2048, 128) blocks (amortized at large N;
    # padded lanes compute w*0+b and are sliced off below).
    x2d = jnp.pad(x_flat, (0, padded - n)).reshape(rows, _LANES)

    y2d = pl.pallas_call(
        _affine_kernel,
        out_shape=jax.ShapeDtypeStruct((rows, _LANES), jnp.float32),
        grid=(n_blocks,),
        in_specs=[
            pl.BlockSpec(memory_space=pltpu.MemorySpace.SMEM),       # [w, b]
            pl.BlockSpec((_BLOCK_ROWS, _LANES), lambda i: (i, 0)),   # x tile
        ],
        out_specs=pl.BlockSpec((_BLOCK_ROWS, _LANES), lambda i: (i, 0)),
        compiler_params=pltpu.CompilerParams(
            dimension_semantics=("parallel",)),
    )(params, x2d)
    return y2d.reshape(padded)[:n]


@jax.jit
def linear_forward(x, W, b):
    """y = x @ W + b for x: (N, 1), W: (1, 1), b: (1, 1) -> (N, 1) f32."""
    n, f_in = x.shape
    assert f_in == 1 and W.shape == (1, 1) and b.shape == (1, 1)
    # Pack the two scalar parameters into a single flat f32[2] SMEM operand.
    params = jnp.concatenate([W.reshape(1), b.reshape(1)]).astype(jnp.float32)
    x32 = x.astype(jnp.float32)
    if n <= _SMALL_N_MAX:
        return _forward_single_block(params, x32)
    return _forward_tiled(params, x32.reshape(n)).reshape(n, 1)


if __name__ == "__main__":
    key = jax.random.PRNGKey(0)

    # Mirror the script's synthetic data: x ~ U[0,1) of shape (100, 1).
    N = 100
    x = jax.random.uniform(key, (N, 1), dtype=jnp.float32)

    # Parameters per Model.__init__ shapes: W (1,1), b (1,1). torch inits them
    # to zeros; use non-trivial values (the target y = 5 + 2x) so the kernel
    # does real work.
    W = jnp.full((1, 1), 2.0, dtype=jnp.float32)
    b = jnp.full((1, 1), 5.0, dtype=jnp.float32)

    # Small-N path: single dispatch on the natural (100, 1) array.
    y = jax.block_until_ready(linear_forward(x, W, b))
    y_ref = x @ W + b
    assert y.shape == (N, 1)
    assert jnp.allclose(y, y_ref, atol=1e-6, rtol=1e-6)

    # Exercise the large-N lane-dense grid path as well (still tiny: ~1.2 MB).
    N2 = 300_000
    x2 = jax.random.uniform(jax.random.PRNGKey(1), (N2, 1), dtype=jnp.float32)
    y2 = jax.block_until_ready(linear_forward(x2, W, b))
    assert y2.shape == (N2, 1)
    assert jnp.allclose(y2, x2 * 2.0 + 5.0, atol=1e-5, rtol=1e-5)

    print("KERNEL_OK")
</pallas_src>

<mosaic_0001>
module attributes {stable_mosaic.version = 11 : i64} {
  func.func @_affine_kernel(%arg0: memref<2xf32, #tpu.memory_space<smem>>, %arg1: memref<100x1xf32, #tpu.memory_space<vmem>>, %arg2: memref<100x1xf32, #tpu.memory_space<vmem>>) attributes {dimension_semantics = [], scalar_prefetch = 0 : i64, scratch_operands = 0 : i64, tpu.core_type = #tpu.core_type<tc>} {
    %c0 = arith.constant 0 : index
    %c0_0 = arith.constant 0 : index
    %0 = vector.load %arg1[%c0, %c0_0] : memref<100x1xf32, #tpu.memory_space<vmem>>, vector<100x1xf32>
    %c0_1 = arith.constant 0 : index
    %1 = memref.load %arg0[%c0_1] : memref<2xf32, #tpu.memory_space<smem>>
    %2 = vector.broadcast %1 : f32 to vector<100x1xf32>
    %3 = arith.mulf %0, %2 : vector<100x1xf32>
    %c1 = arith.constant 1 : index
    %4 = memref.load %arg0[%c1] : memref<2xf32, #tpu.memory_space<smem>>
    %5 = vector.broadcast %4 : f32 to vector<100x1xf32>
    %6 = arith.addf %3, %5 : vector<100x1xf32>
    %c0_2 = arith.constant 0 : index
    %c0_3 = arith.constant 0 : index
    %7 = vector.load %arg2[%c0_2, %c0_3] : memref<100x1xf32, #tpu.memory_space<vmem>>, vector<100x1xf32>
    tpu.vector_store %arg2[%c0_2, %c0_3], %6 {strides = array<i32>} : memref<100x1xf32, #tpu.memory_space<vmem>>, vector<100x1xf32>,
    return
  }
}

</mosaic_0001>

<bundles_post_ra>
// kernel: linear_forward.1
= control target key start
LH: loop header
LB: loop body
LE: loop exit
PB: predicated region body
PF: predicated region fallthrough
CT: control target
= control target key end

     0   :  { %7 = vsyncpa [#allocation3], 0  ;;  %s212_s0 = inlined_call_operand.vmem [shape: f32[2], index: 0, kind: input, shape index: {}]   ;;  %s213_s1 = inlined_call_operand.vmem [shape: f32[100,1], index: 1, kind: input, shape index: {}]   ;;  %s214_s2 = inlined_call_operand.vmem [shape: f32[100,1], index: 2, kind: output, shape index: {}]  }
   0x1   :  { %s14_s11 = sshll.u32 %s212_s0, 4  ;;  %s15_s11 = int_to_ptr.vmem [resolvable:$true] %s14_s11 }
   0x2   :  { %s89_s12 = scalar_lea.vmem %s15_s11, 16  ;;  %p94_p1 = scmp.lt.s32.totalorder %s15_s11, %s15_s11 }
   0x3   :  { %p90_p0 = scmp.ne.s32.totalorder %s15_s11, %s89_s12  ;;  %p95_p2 = scmp.lt.s32.totalorder %s89_s12, %s89_s12 }
   0x5   :  { %p96_p3 = por %p95_p2, %p94_p1 }
   0x7   :  { %p97_p4 = pnand %p96_p3, %p90_p0 }
   0x9   :  { %100 = shalt.err (!%p97_p4)
}
   0xa   :  { %s103_s13 = smov [#allocation2]  }
   0xb   :  { %17 = dma.vmem_to_smem %s15_s11, 16, %s103_s13, [#allocation3]  }
   0xc   :  { %101 = dma.done.wait [#allocation3], 16  }
   0xd   :  { %102 = vsyncadd [#allocation3], 4294967280 }
   0xe   :  { %23 = sfence }
   0xf   :  { %s37_s14 = sld [smem:[#allocation2]]  ;;  %s87_s15 = sld [smem:[#allocation2 + $0x1]]  ;;  %v24_v0 = vld [vmem:[%s213_s1] sm:$0xff]  ;;  %v25_v1 = vld [vmem:[%s213_s1 + $0x8] sm:$0xff]  ;;  %v26_v2 = vld [vmem:[%s213_s1 + $0x10] sm:$0xff]  ;;  %vm67_vm0 = vcmask 7168  }
  0x10   :  { %v27_v3 = vld [vmem:[%s213_s1 + $0x18] sm:$0xff]  ;;  %v28_v4 = vld [vmem:[%s213_s1 + $0x20] sm:$0xff]  ;;  %v29_v5 = vld [vmem:[%s213_s1 + $0x28] sm:$0xff]  ;;  %vm80_vm1 = vcmask 3072  }
  0x11   :  { %v30_v6 = vld [vmem:[%s213_s1 + $0x30] sm:$0xff]  ;;  %v31_v7 = vld [vmem:[%s213_s1 + $0x38] sm:$0xff]  ;;  %v32_v14 = vld [vmem:[%s213_s1 + $0x40] sm:$0xff] }
  0x12   :  { %v33_v19 = vld [vmem:[%s213_s1 + $0x48] sm:$0xff]  ;;  %v34_v20 = vld [vmem:[%s213_s1 + $0x50] sm:$0xff]  ;;  %v35_v21 = vld [vmem:[%s213_s1 + $0x58] sm:$0xff] }
  0x13   :  { %v36_v26 = vld [vmem:[%s213_s1 + $0x60] sm:$0xf] }
  0x15   :  { %v38_v8 = vstv %s37_s14  ;;  %v53_v9 = vstv %s87_s15 }
  0x16   :  { %v39_v10 = vmul.f32 %v38_v8, %v24_v0  ;;  %v40_v11 = vmul.f32 %v38_v8, %v25_v1  ;;  %v41_v12 = vmul.f32 %v38_v8, %v26_v2  ;;  %v42_v13 = vmul.f32 %v38_v8, %v27_v3 }
  0x17   :  { %v43_v15 = vmul.f32 %v38_v8, %v28_v4  ;;  %v44_v16 = vmul.f32 %v38_v8, %v29_v5  ;;  %v45_v17 = vmul.f32 %v38_v8, %v30_v6  ;;  %v46_v18 = vmul.f32 %v38_v8, %v31_v7 }
  0x18   :  { %v54_v22 = vadd.f32 %v53_v9, %v39_v10  ;;  %v55_v23 = vadd.f32 %v53_v9, %v40_v11  ;;  %v56_v24 = vadd.f32 %v53_v9, %v41_v12  ;;  %v57_v25 = vadd.f32 %v53_v9, %v42_v13 }
  0x19   :  { %v58_v27 = vadd.f32 %v53_v9, %v43_v15  ;;  %v59_v28 = vadd.f32 %v53_v9, %v44_v16  ;;  %v60_v29 = vadd.f32 %v53_v9, %v45_v17  ;;  %v61_v30 = vadd.f32 %v53_v9, %v46_v18 }
  0x1a   :  { %68 = vst.msk [vmem:[%s214_s2] sm:$0xff] %vm67_vm0, %v54_v22  ;;  %69 = vst.msk [vmem:[%s214_s2 + $0x8] sm:$0xff] %vm67_vm0, %v55_v23  ;;  %v47_v31 = vmul.f32 %v38_v8, %v32_v14  ;;  %v48_v32 = vmul.f32 %v38_v8, %v33_v19  ;;  %v49_v33 = vmul.f32 %v38_v8, %v34_v20 }
  0x1b   :  { %70 = vst.msk [vmem:[%s214_s2 + $0x10] sm:$0xff] %vm67_vm0, %v56_v24  ;;  %71 = vst.msk [vmem:[%s214_s2 + $0x18] sm:$0xff] %vm67_vm0, %v57_v25  ;;  %v50_v34 = vmul.f32 %v38_v8, %v35_v21  ;;  %v51_v35 = vmul.f32 %v38_v8, %v36_v26 }
  0x1c   :  { %72 = vst.msk [vmem:[%s214_s2 + $0x20] sm:$0xff] %vm67_vm0, %v58_v27  ;;  %73 = vst.msk [vmem:[%s214_s2 + $0x28] sm:$0xff] %vm67_vm0, %v59_v28  ;;  %v62_v36 = vadd.f32 %v53_v9, %v47_v31  ;;  %v63_v37 = vadd.f32 %v53_v9, %v48_v32  ;;  %v64_v38 = vadd.f32 %v53_v9, %v49_v33 }
  0x1d   :  { %74 = vst.msk [vmem:[%s214_s2 + $0x30] sm:$0xff] %vm67_vm0, %v60_v29  ;;  %75 = vst.msk [vmem:[%s214_s2 + $0x38] sm:$0xff] %vm67_vm0, %v61_v30  ;;  %v65_v39 = vadd.f32 %v53_v9, %v50_v34  ;;  %v66_v40 = vadd.f32 %v53_v9, %v51_v35 }
  0x1e   :  { %76 = vst.msk [vmem:[%s214_s2 + $0x40] sm:$0xff] %vm67_vm0, %v62_v36  ;;  %77 = vst.msk [vmem:[%s214_s2 + $0x48] sm:$0xff] %vm67_vm0, %v63_v37 }
  0x1f   :  { %78 = vst.msk [vmem:[%s214_s2 + $0x50] sm:$0xff] %vm67_vm0, %v64_v38  ;;  %79 = vst.msk [vmem:[%s214_s2 + $0x58] sm:$0xff] %vm67_vm0, %v65_v39 }
  0x20   :  { %81 = vst.msk [vmem:[%s214_s2 + $0x60] sm:$0xf] %vm80_vm1, %v66_v40 }
  0x21   :  { %86 = vsyncpa [#allocation3], 1 }

</bundles_post_ra>
